<compile_context>
chip_gen: v7x
topology: tpu7x:2x2x1
jax: 0.10.0
libtpu: 0.0.40
codegen_flags: <defaults>
</compile_context>

<pallas_src>
import functools

import jax
import jax.numpy as jnp
import numpy as np
from jax.experimental import pallas as pl
from jax.experimental.pallas import tpu as pltpu


def _round_up(x: int, m: int) -> int:
    return ((x + m - 1) // m) * m


def mlp_kernel(x_ref, w1_ref, b1_ref, w2_ref, b2_ref, w3_ref, b3_ref, o_ref):
    # Layer 1: fc1 + relu1 (bf16/f32 MXU operands, f32 accumulate, f32 epilogue)
    h1 = jnp.dot(x_ref[...], w1_ref[...], preferred_element_type=jnp.float32)
    h1 = jnp.maximum(h1 + b1_ref[...], 0.0)
    # Layer 2: fc2 + relu2
    h2 = jnp.dot(h1.astype(w2_ref.dtype), w2_ref[...],
                 preferred_element_type=jnp.float32)
    h2 = jnp.maximum(h2 + b2_ref[...], 0.0)
    # Layer 3: fc3 + relu3 -- output kept at the true column count (no 128-lane
    # padding), so the HBM writeback is only n_out columns per row.
    h3 = jnp.dot(h2.astype(w3_ref.dtype), w3_ref[...],
                 preferred_element_type=jnp.float32)
    h3 = jnp.maximum(h3 + b3_ref[...], 0.0)
    o_ref[...] = h3.astype(o_ref.dtype)


@functools.partial(jax.jit, static_argnames=("block_b", "compute_dtype"))
def simple_mlp_forward(x, params, *, block_b=32768, compute_dtype=jnp.bfloat16):
    """x: (B, n_node_features); params: dict with w1,b1,w2,b2,w3,b3.

    Weights w_i are (in, out); biases b_i are (1, out). Returns (B, n_out) in
    x.dtype.  compute_dtype (default bf16) applies to the matmul operands only;
    accumulation and the bias/ReLU epilogue stay f32.  Pass compute_dtype=None
    for an exact f32 path.
    """
    w1, b1 = params["w1"], params["b1"]
    w2, b2 = params["w2"], params["b2"]
    w3, b3 = params["w3"], params["b3"]

    B, n_in = x.shape
    h1d, h2d = w1.shape[1], w2.shape[1]
    n_out = w3.shape[1]

    # --- Matmul operand dtype (bf16 default halves read traffic; f32 acc). ---
    if compute_dtype is not None:
        x_c = x.astype(compute_dtype)
        w1c, w2c, w3c = (w.astype(compute_dtype) for w in (w1, w2, w3))
    else:
        x_c, w1c, w2c, w3c = x, w1, w2, w3
    # Biases stay f32: epilogue (bias add + ReLU) runs in f32 (v5e-friendly).
    b1 = b1.astype(jnp.float32)
    b2 = b2.astype(jnp.float32)
    b3 = b3.astype(jnp.float32)

    # --- Batch tiling ---
    #  * multiple of 16 rows (f32 sublane=8, bf16 packs 16 rows per vreg)
    #  * large tile (default 32K rows) to amortize per-grid-step overhead
    #  * cap so grid >= ~8 when B allows -> both v7x TensorCores get tiles
    #    under dimension_semantics=("parallel",)
    tb = min(int(block_b), _round_up(B, 16))
    tb = min(tb, max(_round_up(pl.cdiv(B, 8), 16), 16))
    tb = _round_up(tb, 16)
    B_pad = _round_up(B, tb)
    if B_pad != B:
        x_c = jnp.pad(x_c, ((0, B_pad - B), (0, 0)))
    grid = (B_pad // tb,)

    x_spec = pl.BlockSpec((tb, n_in), lambda i: (i, 0))
    out_spec = pl.BlockSpec((tb, n_out), lambda i: (i, 0))

    def resident(arr):  # weights/biases: same block every step -> VMEM-resident
        return pl.BlockSpec(arr.shape, lambda i: (0, 0))

    # --- VMEM budget: only raise the scoped limit if double-buffered tiles
    #     would exceed the smallest (v5e) default of 16 MiB. ---
    x_tile_bytes = tb * n_in * jnp.dtype(x_c.dtype).itemsize
    out_tile_bytes = tb * n_out * jnp.dtype(x.dtype).itemsize
    weight_bytes = sum(int(np.prod(a.shape)) * jnp.dtype(a.dtype).itemsize
                       for a in (w1c, b1, w2c, b2, w3c, b3))
    pipeline_bytes = 2 * (x_tile_bytes + out_tile_bytes) + 2 * weight_bytes
    vmem_limit = None
    if pipeline_bytes > 12 * 1024 * 1024:
        vmem_limit = int(min(2 * pipeline_bytes, 48 * 1024 * 1024))

    cost = pl.CostEstimate(
        flops=2 * B_pad * (n_in * h1d + h1d * h2d + h2d * n_out),
        transcendentals=0,
        bytes_accessed=B_pad * n_in * jnp.dtype(x_c.dtype).itemsize
        + B_pad * n_out * jnp.dtype(x.dtype).itemsize
        + weight_bytes,
    )

    out = pl.pallas_call(
        mlp_kernel,
        out_shape=jax.ShapeDtypeStruct((B_pad, n_out), x.dtype),
        grid=grid,
        in_specs=[x_spec,
                  resident(w1c), resident(b1),
                  resident(w2c), resident(b2),
                  resident(w3c), resident(b3)],
        out_specs=out_spec,
        compiler_params=pltpu.CompilerParams(
            dimension_semantics=("parallel",),
            vmem_limit_bytes=vmem_limit),
        cost_estimate=cost,
    )(x_c, w1c, b1, w2c, b2, w3c, b3)

    return out[:B]


def init_params(key, n_node_features, n_out_classes, hidden_layers):
    """Deterministic init mimicking torch.nn.Linear default (U[-1/sqrt(fan_in), +])."""
    dims = [n_node_features, hidden_layers[0], hidden_layers[1], n_out_classes]
    params = {}
    for i in range(3):
        fan_in, fan_out = dims[i], dims[i + 1]
        key, kw, kb = jax.random.split(key, 3)
        bound = 1.0 / np.sqrt(fan_in)
        params[f"w{i+1}"] = jax.random.uniform(
            kw, (fan_in, fan_out), jnp.float32, -bound, bound)  # (in, out)
        params[f"b{i+1}"] = jax.random.uniform(
            kb, (1, fan_out), jnp.float32, -bound, bound)       # (1, out)
    return params


def reference_forward(x, params):
    h = jnp.maximum(x @ params["w1"] + params["b1"], 0.0)
    h = jnp.maximum(h @ params["w2"] + params["b2"], 0.0)
    return jnp.maximum(h @ params["w3"] + params["b3"], 0.0)


if __name__ == "__main__":
    # Small shapes consistent with the module: x is (batch, n_node_features).
    n_node_features = 16
    n_out_classes = 4
    hidden_layers = (32, 32)
    batch = 8

    key = jax.random.PRNGKey(0)
    key, kx = jax.random.split(key)
    x = jax.random.normal(kx, (batch, n_node_features), jnp.float32)
    params = init_params(key, n_node_features, n_out_classes, hidden_layers)
    ref = reference_forward(x, params)

    # Exact f32 path: tight check.
    out_f32 = jax.block_until_ready(
        simple_mlp_forward(x, params, compute_dtype=None))
    np.testing.assert_allclose(np.asarray(out_f32), np.asarray(ref),
                               rtol=1e-5, atol=1e-5)

    # Default bf16-operand path: looser tolerance (expected bf16 cast error).
    out_bf16 = jax.block_until_ready(simple_mlp_forward(x, params))
    np.testing.assert_allclose(np.asarray(out_bf16), np.asarray(ref),
                               rtol=2e-2, atol=2e-2)

    print("KERNEL_OK")
</pallas_src>

<mosaic_0001>
module attributes {stable_mosaic.version = 11 : i64} {
  func.func @mlp_kernel(%arg0: i32, %arg1: memref<16x16xf32, #tpu.memory_space<vmem>>, %arg2: memref<16x32xf32, #tpu.memory_space<vmem>>, %arg3: memref<1x32xf32, #tpu.memory_space<vmem>>, %arg4: memref<32x32xf32, #tpu.memory_space<vmem>>, %arg5: memref<1x32xf32, #tpu.memory_space<vmem>>, %arg6: memref<32x4xf32, #tpu.memory_space<vmem>>, %arg7: memref<1x4xf32, #tpu.memory_space<vmem>>, %arg8: memref<16x4xf32, #tpu.memory_space<vmem>>) attributes {dimension_semantics = [#tpu.dimension_semantics<parallel>], iteration_bounds = array<i64: 1>, scalar_prefetch = 0 : i64, scratch_operands = 0 : i64, tpu.core_type = #tpu.core_type<tc>, window_params = [{transform_indices = @transform_0, window_bounds = array<i64: 16, 16>}, {pipeline_mode = #tpu.pipeline_mode<synchronous>, transform_indices = @transform_1, window_bounds = array<i64: 16, 32>}, {pipeline_mode = #tpu.pipeline_mode<synchronous>, transform_indices = @transform_2, window_bounds = array<i64: 1, 32>}, {pipeline_mode = #tpu.pipeline_mode<synchronous>, transform_indices = @transform_3, window_bounds = array<i64: 32, 32>}, {pipeline_mode = #tpu.pipeline_mode<synchronous>, transform_indices = @transform_4, window_bounds = array<i64: 1, 32>}, {pipeline_mode = #tpu.pipeline_mode<synchronous>, transform_indices = @transform_5, window_bounds = array<i64: 32, 4>}, {pipeline_mode = #tpu.pipeline_mode<synchronous>, transform_indices = @transform_6, window_bounds = array<i64: 1, 4>}, {transform_indices = @transform_7, window_bounds = array<i64: 16, 4>}]} {
    %c0 = arith.constant 0 : index
    %c0_0 = arith.constant 0 : index
    %0 = vector.load %arg1[%c0, %c0_0] : memref<16x16xf32, #tpu.memory_space<vmem>>, vector<16x16xf32>
    %c0_1 = arith.constant 0 : index
    %c0_2 = arith.constant 0 : index
    %1 = vector.load %arg2[%c0_1, %c0_2] : memref<16x32xf32, #tpu.memory_space<vmem>>, vector<16x32xf32>
    %cst = arith.constant dense<0.000000e+00> : vector<16x32xf32>
    %2 = tpu.matmul %0, %1, %cst {dimension_numbers = #tpu.dot_dimension_numbers<[1], [0], [0], [1], [0, 0, 1, 1], [], []>} : vector<16x16xf32>, vector<16x32xf32>, vector<16x32xf32> -> vector<16x32xf32>
    %c0_3 = arith.constant 0 : index
    %c0_4 = arith.constant 0 : index
    %3 = vector.load %arg3[%c0_3, %c0_4] : memref<1x32xf32, #tpu.memory_space<vmem>>, vector<1x32xf32>
    %4 = vector.broadcast %3 : vector<1x32xf32> to vector<16x32xf32>
    %5 = arith.addf %2, %4 : vector<16x32xf32>
    %cst_5 = arith.constant 0.000000e+00 : f32
    %6 = vector.broadcast %cst_5 : f32 to vector<16x32xf32>
    %7 = arith.maximumf %5, %6 : vector<16x32xf32>
    %c0_6 = arith.constant 0 : index
    %c0_7 = arith.constant 0 : index
    %8 = vector.load %arg4[%c0_6, %c0_7] : memref<32x32xf32, #tpu.memory_space<vmem>>, vector<32x32xf32>
    %cst_8 = arith.constant dense<0.000000e+00> : vector<16x32xf32>
    %9 = tpu.matmul %7, %8, %cst_8 {dimension_numbers = #tpu.dot_dimension_numbers<[1], [0], [0], [1], [0, 0, 1, 1], [], []>} : vector<16x32xf32>, vector<32x32xf32>, vector<16x32xf32> -> vector<16x32xf32>
    %c0_9 = arith.constant 0 : index
    %c0_10 = arith.constant 0 : index
    %10 = vector.load %arg5[%c0_9, %c0_10] : memref<1x32xf32, #tpu.memory_space<vmem>>, vector<1x32xf32>
    %11 = vector.broadcast %10 : vector<1x32xf32> to vector<16x32xf32>
    %12 = arith.addf %9, %11 : vector<16x32xf32>
    %cst_11 = arith.constant 0.000000e+00 : f32
    %13 = vector.broadcast %cst_11 : f32 to vector<16x32xf32>
    %14 = arith.maximumf %12, %13 : vector<16x32xf32>
    %c0_12 = arith.constant 0 : index
    %c0_13 = arith.constant 0 : index
    %15 = vector.load %arg6[%c0_12, %c0_13] : memref<32x4xf32, #tpu.memory_space<vmem>>, vector<32x4xf32>
    %cst_14 = arith.constant dense<0.000000e+00> : vector<16x4xf32>
    %16 = tpu.matmul %14, %15, %cst_14 {dimension_numbers = #tpu.dot_dimension_numbers<[1], [0], [0], [1], [0, 0, 1, 1], [], []>} : vector<16x32xf32>, vector<32x4xf32>, vector<16x4xf32> -> vector<16x4xf32>
    %c0_15 = arith.constant 0 : index
    %c0_16 = arith.constant 0 : index
    %17 = vector.load %arg7[%c0_15, %c0_16] : memref<1x4xf32, #tpu.memory_space<vmem>>, vector<1x4xf32>
    %18 = vector.broadcast %17 : vector<1x4xf32> to vector<16x4xf32>
    %19 = arith.addf %16, %18 : vector<16x4xf32>
    %cst_17 = arith.constant 0.000000e+00 : f32
    %20 = vector.broadcast %cst_17 : f32 to vector<16x4xf32>
    %21 = arith.maximumf %19, %20 : vector<16x4xf32>
    %c0_18 = arith.constant 0 : index
    %c0_19 = arith.constant 0 : index
    %22 = vector.load %arg8[%c0_18, %c0_19] : memref<16x4xf32, #tpu.memory_space<vmem>>, vector<16x4xf32>
    tpu.vector_store %arg8[%c0_18, %c0_19], %21 {strides = array<i32>} : memref<16x4xf32, #tpu.memory_space<vmem>>, vector<16x4xf32>,
    return
  }
  func.func @transform_0(%arg0: i32) -> (i32, i32) {
    %c0_i32 = arith.constant 0 : i32
    %c0_i32_0 = arith.constant 0 : i32
    return %arg0, %c0_i32 : i32, i32
  }
  func.func @transform_1(%arg0: i32) -> (i32, i32) {
    %c0_i32 = arith.constant 0 : i32
    %c0_i32_0 = arith.constant 0 : i32
    %c0_i32_1 = arith.constant 0 : i32
    return %c0_i32, %c0_i32_0 : i32, i32
  }
  func.func @transform_2(%arg0: i32) -> (i32, i32) {
    %c0_i32 = arith.constant 0 : i32
    %c0_i32_0 = arith.constant 0 : i32
    %c0_i32_1 = arith.constant 0 : i32
    return %c0_i32, %c0_i32_0 : i32, i32
  }
  func.func @transform_3(%arg0: i32) -> (i32, i32) {
    %c0_i32 = arith.constant 0 : i32
    %c0_i32_0 = arith.constant 0 : i32
    %c0_i32_1 = arith.constant 0 : i32
    return %c0_i32, %c0_i32_0 : i32, i32
  }
  func.func @transform_4(%arg0: i32) -> (i32, i32) {
    %c0_i32 = arith.constant 0 : i32
    %c0_i32_0 = arith.constant 0 : i32
    %c0_i32_1 = arith.constant 0 : i32
    return %c0_i32, %c0_i32_0 : i32, i32
  }
  func.func @transform_5(%arg0: i32) -> (i32, i32) {
    %c0_i32 = arith.constant 0 : i32
    %c0_i32_0 = arith.constant 0 : i32
    %c0_i32_1 = arith.constant 0 : i32
    return %c0_i32, %c0_i32_0 : i32, i32
  }
  func.func @transform_6(%arg0: i32) -> (i32, i32) {
    %c0_i32 = arith.constant 0 : i32
    %c0_i32_0 = arith.constant 0 : i32
    %c0_i32_1 = arith.constant 0 : i32
    return %c0_i32, %c0_i32_0 : i32, i32
  }
  func.func @transform_7(%arg0: i32) -> (i32, i32) {
    %c0_i32 = arith.constant 0 : i32
    %c0_i32_0 = arith.constant 0 : i32
    return %arg0, %c0_i32 : i32, i32
  }
}

</mosaic_0001>

<bundles_post_ra>
// kernel: simple_mlp_forward.1
= control target key start
LH: loop header
LB: loop body
LE: loop exit
PB: predicated region body
PF: predicated region fallthrough
CT: control target
= control target key end

     0   :  { %vm37_vm0 = vcmask 130048   ;;  %vm132_vm1 = vcmask 261120   ;;  %vm310_vm2 = vcmask 31744   ;;  %s486_s1 = inlined_call_operand.vmem [shape: f32[16,32], index: 1, kind: input, shape index: {}]   ;;  %s487_s0 = inlined_call_operand.vmem [shape: f32[16,16], index: 0, kind: input, shape index: {}]   ;;  %s488_s3 = inlined_call_operand.vmem [shape: f32[32,32], index: 3, kind: input, shape index: {}]   ;;  %s489_s5 = inlined_call_operand.vmem [shape: f32[32,4], index: 5, kind: input, shape index: {}]   ;;  %s490_s2 = inlined_call_operand.vmem [shape: f32[1,32], index: 2, kind: input, shape index: {}]   ;;  %s491_s4 = inlined_call_operand.vmem [shape: f32[1,32], index: 4, kind: input, shape index: {}]   ;;  %s492_s6 = inlined_call_operand.vmem [shape: f32[1,4], index: 6, kind: input, shape index: {}]   ;;  %s493_s7 = inlined_call_operand.vmem [shape: f32[16,4], index: 7, kind: output, shape index: {}]  }
   0x1   :  { %v28_v0 = vld [vmem:[%s486_s1] sm:$0xff]  ;;  %v29_v1 = vld [vmem:[%s486_s1 + $0x8] sm:$0xff]  ;;  %v123_v8 = vld [vmem:[%s488_s3 + $0x10] sm:$0xff] }
   0x2   :  { %v26_v2 = vld [vmem:[%s487_s0] sm:$0xff]  ;;  %v371_v3 = vpack.c.bf16 %v29_v1, %v28_v0  ;;  %v122_v5 = vld [vmem:[%s488_s3 + $0x8] sm:$0xff]  ;;  %v124_v9 = vld [vmem:[%s488_s3 + $0x18] sm:$0xff] }
   0x3   :  { %346 = vmatprep.mubr.msk.f32.mxu0 %vm37_vm0, %v26_v2  ;;  %v121_v4 = vld [vmem:[%s488_s3] sm:$0xff]  ;;  %v27_v7 = vld [vmem:[%s487_s0 + $0x8] sm:$0xff]  ;;  %v379_v10 = vpack.c.bf16 %v124_v9, %v123_v8  ;;  %v218_v21 = vld [vmem:[%s489_s5 + $0x10] sm:$0xff] }
   0x4   :  { %v375_v6 = vpack.c.bf16 %v122_v5, %v121_v4  ;;  %372 = vmatprep.subr.bf16.mxu0 %v371_v3  ;;  %v216_v11 = vld [vmem:[%s489_s5] sm:$0xff]  ;;  %v217_v12 = vld [vmem:[%s489_s5 + $0x8] sm:$0xff]  ;;  %v219_v22 = vld [vmem:[%s489_s5 + $0x18] sm:$0xff] }
   0x5   :  { %374 = vmatpush3.bf16.msra.mxu0 %v371_v3  ;;  %v383_v13 = vpack.c.bf16 %v217_v12, %v216_v11  ;;  %v317_v14 = vld [vmem:[%s490_s2] ss:$0 sm:$0xff]  ;;  %v387_v23 = vpack.c.bf16 %v219_v22, %v218_v21 }
   0x6   :  { %376 = vmatprep.subr.bf16.mxu1 %v375_v6  ;;  %v320_v24 = vld [vmem:[%s491_s4] ss:$0 sm:$0xff] }
   0x7   :  { %378 = vmatpush3.bf16.msra.mxu1 %v375_v6  ;;  %384 = vmatprep.subr.bf16.mxu0 %v383_v13  ;;  %v323_v31 = vld [vmem:[%s492_s6] ss:$0 sm:$0xff] }
   0x8   :  { %347 = vmatmul.mubr.msk.f32.vlgmr.msra.gmra.mrb[0].mxu0 %vm37_vm0, %v27_v7  ;;  %380 = vmatprep.subr.bf16.mxu1 %v379_v10 }
   0x9   :  { %386 = vmatpush3.bf16.msra.mxu0 %v383_v13 }
   0xa   :  { %388 = vmatprep.subr.bf16.mxu0 %v387_v23 }
   0xb   :  { %382 = vmatpush3.bf16.msra.mxu1 %v379_v10 }
   0xd   :  { %390 = vmatpush3.bf16.msra.mxu0 %v387_v23 }
  0xdb   :  { %v348_v15 = vpop.f32.mrb[0].mxu0 }
  0xdc   :  { %v116_v16 = vadd.f32 %v348_v15, %v317_v14  ;;  %v110_v17 = vpop.f32.mrb[1].mxu0 }
  0xdd   :  { %v111_v18 = vadd.f32 %v317_v14, %v110_v17 }
  0xde   :  { %v120_v20 = vmax.f32 %v116_v16, 0.0 }
  0xdf   :  { %v119_v19 = vmax.f32 %v111_v18, 0.0 }
  0xe1   :  { %357 = vmatprep.mubr.msk.f32.mxu1 %vm132_vm1, %v119_v19 }
  0xe2   :  { %358 = vmatmul.mubr.msk.f32.vlgmr.msra.gmra.mrb[0].mxu1 %vm132_vm1, %v120_v20 }
 0x1b5   :  { %v359_v25 = vpop.f32.mrb[0].mxu1 }
 0x1b6   :  { %v211_v26 = vadd.f32 %v359_v25, %v320_v24  ;;  %v205_v27 = vpop.f32.mrb[1].mxu1 }
 0x1b7   :  { %v206_v28 = vadd.f32 %v320_v24, %v205_v27 }
 0x1b8   :  { %v215_v30 = vmax.f32 %v211_v26, 0.0 }
 0x1b9   :  { %v214_v29 = vmax.f32 %v206_v28, 0.0 }
 0x1bb   :  { %368 = vmatprep.mubr.msk.f32.mxu0 %vm132_vm1, %v214_v29 }
 0x1bc   :  { %369 = vmatmul.mubr.msk.f32.vlgmr.msra.gmra.mrb[2].mxu0 %vm132_vm1, %v215_v30 }
 0x28f   :  { %v370_v32 = vpop.f32.mrb[2].mxu0 }
 0x290   :  { %v305_v33 = vadd.f32 %v370_v32, %v323_v31  ;;  %v299_v34 = vpop.f32.mrb[3].mxu0 }
 0x291   :  { %v300_v35 = vadd.f32 %v323_v31, %v299_v34 }
 0x292   :  { %v309_v36 = vmax.f32 %v305_v33, 0.0 }
 0x293   :  { %v308_v37 = vmax.f32 %v300_v35, 0.0 }
 0x294   :  { %312 = vst.msk [vmem:[%s493_s7 + $0x8] sm:$0xff] %vm310_vm2, %v309_v36 }
 0x295   :  { %311 = vst.msk [vmem:[%s493_s7] sm:$0xff] %vm310_vm2, %v308_v37 }

</bundles_post_ra>
